<compile_context>
chip_gen: v7x
topology: tpu7x:2x2x1
jax: 0.10.0
libtpu: 0.0.40
codegen_flags: <defaults>
</compile_context>

<pallas_src>
import math

import jax
import jax.numpy as jnp
import numpy as np
from jax import lax
from jax.experimental import pallas as pl
from jax.experimental.pallas import tpu as pltpu

# ---- small synthetic Gemma config ----
BATCH = 2
SEQ = 8
HIDDEN = 64
NUM_HEADS = 4
HEAD_DIM = 16
NUM_KV_HEADS = 2
INTERMEDIATE = 128
RMS_EPS = 1e-6
ROPE_THETA = 10000.0
KV_GROUPS = NUM_HEADS // NUM_KV_HEADS  # repeat_kv factor
QW = NUM_HEADS * HEAD_DIM              # 64 = width of q / repeated k / repeated v


def _rms_norm(h, w_row):
    # Gemma RMSNorm: x * rsqrt(mean(x^2) + eps) * (1 + weight)   (float32)
    var = jnp.mean(h * h, axis=-1, keepdims=True)
    return h * jax.lax.rsqrt(var + RMS_EPS) * (1.0 + w_row)


def _gelu_tanh(x):
    c = 0.7978845608028654  # sqrt(2/pi)
    return 0.5 * x * (1.0 + jnp.tanh(c * (x + 0.044715 * x * x * x)))


def gemma_decoder_layer_kernel(
    x_ref,      # (BS, HIDDEN) f32
    mask_ref,   # (BS, NH*BS) f32   block-diag additive mask, tiled per head
    cos_ref,    # (BS, QW) f32      rope cos, natural per-head layout
    sa_ref,     # (BS, QW) f32      -sin on first-half lanes of each head, 0 else
    sb_ref,     # (BS, QW) f32      +sin on second-half lanes of each head, 0 else
    seg_ref,    # (QW, QW) f32      0/1 head-segment mask (16-wide segments)
    wqkv_ref,   # (HIDDEN, 3*QW) bf16  [Wq*scale | Wk_rep | Wv_rep]
    wo_ref,     # (QW, HIDDEN) bf16
    ln1_ref, ln2_ref,                # (1, HIDDEN) f32
    wgu_ref,    # (HIDDEN, 2*INTERMEDIATE) bf16
    wd_ref,     # (INTERMEDIATE, HIDDEN) bf16
    out_ref,    # (BS, HIDDEN) f32
):
    x = x_ref[...]
    seg = seg_ref[...]
    cos = cos_ref[...]
    sa = sa_ref[...]
    sb = sb_ref[...]

    # ---- input_layernorm (f32) ----
    h = _rms_norm(x, ln1_ref[...])
    hb = h.astype(jnp.bfloat16)

    # ---- fused q/k/v projection (bias-free); kv heads pre-repeated and
    #      1/sqrt(head_dim) pre-folded into the q columns ----
    qkv = jnp.dot(hb, wqkv_ref[...], preferred_element_type=jnp.float32)  # (BS, 192)
    q = qkv[:, :QW]
    k = qkv[:, QW:2 * QW]
    v = qkv[:, 2 * QW:3 * QW]

    # ---- full-width RoPE: per-head rotate_half via two whole-row rolls.
    #      The wrap-around lanes of each roll land where sa/sb are zero. ----
    def rope(t):
        return (t * cos
                + pltpu.roll(t, shift=QW - HEAD_DIM // 2, axis=1) * sa
                + pltpu.roll(t, shift=HEAD_DIM // 2, axis=1) * sb)

    qr = rope(q).astype(jnp.bfloat16)          # (BS, QW)
    kr = rope(k)                               # (BS, QW) f32

    # ---- block-structured K rows / block-diagonal V (head-batched attention) ----
    # row index = head*BS + key_token ; seg zeroes columns outside that head.
    k_blk = (jnp.tile(kr, (NUM_HEADS, 1)) * seg).astype(jnp.bfloat16)   # (NH*BS, QW)
    v_blk = (jnp.tile(v, (NUM_HEADS, 1)) * seg).astype(jnp.bfloat16)    # (NH*BS, QW)

    # scores for all heads in ONE NT matmul: s[q, h*BS + kt] = <q_h[q], k_h[kt]>
    s = lax.dot_general(qr, k_blk, (((1,), (1,)), ((), ())),
                        preferred_element_type=jnp.float32)             # (BS, NH*BS)
    s = s + mask_ref[...]
    # Shared per-row max is a valid per-segment softmax shift (softmax is
    # shift-invariant within each 16-lane head segment).
    s = s - jnp.max(s, axis=-1, keepdims=True)
    p = jnp.exp(s)
    # per-head-segment denominators, broadcast across each segment (f32 matmul)
    denom = jnp.dot(p, seg, preferred_element_type=jnp.float32)
    p = p * pl.reciprocal(denom, approx=True)

    # P @ block-diagonal V gives the heads already concatenated for o_proj.
    o = jnp.dot(p.astype(jnp.bfloat16), v_blk,
                preferred_element_type=jnp.float32)                     # (BS, QW)
    attn = jnp.dot(o.astype(jnp.bfloat16), wo_ref[...],
                   preferred_element_type=jnp.float32)

    x = x + attn  # residual 1

    # ---- post_attention_layernorm + GemmaMLP (fused gate|up projection) ----
    h2 = _rms_norm(x, ln2_ref[...])
    h2b = h2.astype(jnp.bfloat16)
    gu = jnp.dot(h2b, wgu_ref[...], preferred_element_type=jnp.float32)  # (BS, 256)
    g = gu[:, :INTERMEDIATE]
    u = gu[:, INTERMEDIATE:]
    act = (_gelu_tanh(g) * u).astype(jnp.bfloat16)
    mlp = jnp.dot(act, wd_ref[...], preferred_element_type=jnp.float32)

    out_ref[...] = x + mlp  # residual 2


def make_params(key):
    ks = jax.random.split(key, 7)
    s = 0.05
    return {
        "wq": jax.random.normal(ks[0], (HIDDEN, NUM_HEADS * HEAD_DIM), jnp.float32) * s,
        "wk": jax.random.normal(ks[1], (HIDDEN, NUM_KV_HEADS * HEAD_DIM), jnp.float32) * s,
        "wv": jax.random.normal(ks[2], (HIDDEN, NUM_KV_HEADS * HEAD_DIM), jnp.float32) * s,
        "wo": jax.random.normal(ks[3], (NUM_HEADS * HEAD_DIM, HIDDEN), jnp.float32) * s,
        "wg": jax.random.normal(ks[4], (HIDDEN, INTERMEDIATE), jnp.float32) * s,
        "wu": jax.random.normal(ks[5], (HIDDEN, INTERMEDIATE), jnp.float32) * s,
        "wd": jax.random.normal(ks[6], (INTERMEDIATE, HIDDEN), jnp.float32) * s,
        "ln1": jnp.full((1, HIDDEN), 0.10, jnp.float32),   # RMSNorm scale params
        "ln2": jnp.full((1, HIDDEN), -0.05, jnp.float32),
    }


def prepare_kernel_weights(params):
    """One-time weight prep (called OUTSIDE jit): scale fold, GQA column
    duplication, QKV / gate-up concatenation, bf16 casts."""
    scale = 1.0 / math.sqrt(HEAD_DIM)

    def repeat_kv_cols(w):  # (H, NKV*D) -> (H, NH*D), head h uses kv head h//G
        return jnp.repeat(w.reshape(HIDDEN, NUM_KV_HEADS, HEAD_DIM),
                          KV_GROUPS, axis=1).reshape(HIDDEN, NUM_HEADS * HEAD_DIM)

    wqkv = jnp.concatenate(
        [params["wq"] * scale, repeat_kv_cols(params["wk"]),
         repeat_kv_cols(params["wv"])], axis=1).astype(jnp.bfloat16)      # (H, 192)
    wgu = jnp.concatenate([params["wg"], params["wu"]],
                          axis=1).astype(jnp.bfloat16)                    # (H, 256)
    return {
        "wqkv": wqkv,
        "wo": params["wo"].astype(jnp.bfloat16),
        "wgu": wgu,
        "wd": params["wd"].astype(jnp.bfloat16),
        "ln1": params["ln1"],
        "ln2": params["ln2"],
    }


@jax.jit
def gemma_decoder_layer(x, attention_mask, position_ids, kw):
    """x: (B,S,H) f32, attention_mask: (B,S,S) additive f32, position_ids: (B,S).
    kw: prepared kernel weights from prepare_kernel_weights()."""
    B, S, Hd = x.shape
    BS = B * S
    # One (QW,QW) segment mask serves K/V block assembly AND the softmax
    # denominator matmul because BS == HEAD_DIM at this toy size.
    assert BS == HEAD_DIM

    # ---- rotary tables in full-width natural per-head layout ----
    inv_freq = 1.0 / (ROPE_THETA ** (
        jnp.arange(0, HEAD_DIM, 2, dtype=jnp.float32) / HEAD_DIM))        # (D/2,)
    freqs = position_ids.astype(jnp.float32).reshape(BS, 1) * inv_freq[None, :]
    cos_h, sin_h = jnp.cos(freqs), jnp.sin(freqs)                          # (BS, D/2)
    z = jnp.zeros_like(sin_h)
    cos64 = jnp.tile(jnp.concatenate([cos_h, cos_h], axis=-1), (1, NUM_HEADS))
    sa64 = jnp.tile(jnp.concatenate([-sin_h, z], axis=-1), (1, NUM_HEADS))
    sb64 = jnp.tile(jnp.concatenate([z, sin_h], axis=-1), (1, NUM_HEADS))

    # ---- block-diagonal additive mask over flattened (b, s) tokens,
    #      tiled across the per-head key blocks of the batched score matrix ----
    neg = jnp.float32(-1e9)
    eye = jnp.eye(B, dtype=bool)                         # (B, B)
    big = jnp.where(eye[:, None, :, None],               # (B,1,B,1)
                    attention_mask[:, :, None, :],       # (B,S,1,S)
                    neg).reshape(BS, BS)
    mask_tiled = jnp.tile(big, (1, NUM_HEADS))           # (BS, NH*BS)

    # ---- 0/1 head-segment mask (16-wide segments) ----
    idx = jnp.arange(QW)
    seg = (idx[:, None] // HEAD_DIM == idx[None, :] // HEAD_DIM).astype(jnp.float32)

    out = pl.pallas_call(
        gemma_decoder_layer_kernel,
        out_shape=jax.ShapeDtypeStruct((BS, Hd), jnp.float32),
    )(x.reshape(BS, Hd), mask_tiled, cos64, sa64, sb64, seg,
      kw["wqkv"], kw["wo"], kw["ln1"], kw["ln2"], kw["wgu"], kw["wd"])

    return out.reshape(B, S, Hd)


def reference_decoder_layer(x, mask, position_ids, params):
    """Pure-JAX reference mirroring the PyTorch module semantics."""
    def rms(h, w):
        var = jnp.mean(h * h, axis=-1, keepdims=True)
        return h * jax.lax.rsqrt(var + RMS_EPS) * (1.0 + w)

    half = HEAD_DIM // 2
    inv_freq = 1.0 / (ROPE_THETA ** (
        jnp.arange(0, HEAD_DIM, 2, dtype=jnp.float32) / HEAD_DIM))
    freqs = position_ids.astype(jnp.float32)[..., None] * inv_freq[None, None, :]
    emb = jnp.concatenate([freqs, freqs], axis=-1)
    cos = jnp.cos(emb)[:, None]  # (B,1,S,D)
    sin = jnp.sin(emb)[:, None]

    def rot_half(t):
        return jnp.concatenate([-t[..., half:], t[..., :half]], axis=-1)

    B, S, _ = x.shape
    h = rms(x, params["ln1"][0])
    q = (h @ params["wq"]).reshape(B, S, NUM_HEADS, HEAD_DIM).transpose(0, 2, 1, 3)
    k = (h @ params["wk"]).reshape(B, S, NUM_KV_HEADS, HEAD_DIM).transpose(0, 2, 1, 3)
    v = (h @ params["wv"]).reshape(B, S, NUM_KV_HEADS, HEAD_DIM).transpose(0, 2, 1, 3)
    q = q * cos + rot_half(q) * sin
    k = k * cos + rot_half(k) * sin
    k = jnp.repeat(k, KV_GROUPS, axis=1)
    v = jnp.repeat(v, KV_GROUPS, axis=1)
    s = jnp.einsum("bhqd,bhkd->bhqk", q, k) / math.sqrt(HEAD_DIM) + mask[:, None]
    w = jax.nn.softmax(s, axis=-1)
    o = jnp.einsum("bhqk,bhkd->bhqd", w, v)
    o = o.transpose(0, 2, 1, 3).reshape(B, S, NUM_HEADS * HEAD_DIM)
    x = x + o @ params["wo"]
    h2 = rms(x, params["ln2"][0])
    g = jax.nn.gelu(h2 @ params["wg"], approximate=True)
    u = h2 @ params["wu"]
    return x + (g * u) @ params["wd"]


if __name__ == "__main__":
    key = jax.random.PRNGKey(0)
    kx, kp = jax.random.split(key)

    x = jax.random.normal(kx, (BATCH, SEQ, HIDDEN), jnp.float32)
    params = make_params(kp)
    kernel_weights = prepare_kernel_weights(params)   # one-time prep, outside jit
    position_ids = jnp.broadcast_to(jnp.arange(SEQ, dtype=jnp.int32), (BATCH, SEQ))

    causal = jnp.tril(jnp.ones((SEQ, SEQ), dtype=bool))
    attention_mask = jnp.where(causal, 0.0, -1e9).astype(jnp.float32)
    attention_mask = jnp.broadcast_to(attention_mask, (BATCH, SEQ, SEQ))

    out = gemma_decoder_layer(x, attention_mask, position_ids, kernel_weights)
    out = jax.block_until_ready(out)

    ref = reference_decoder_layer(x, attention_mask, position_ids, params)
    # bf16 matmul inputs (f32 accumulation) + approx softmax reciprocal in the
    # kernel -> looser tolerance than a pure-f32 check.
    if not np.allclose(np.asarray(out), np.asarray(ref), rtol=2e-2, atol=2e-2):
        raise SystemExit("kernel output mismatch vs pure-JAX reference")

    print("KERNEL_OK")
</pallas_src>

<mosaic_0001>
module attributes {stable_mosaic.version = 11 : i64} {
  func.func @gemma_decoder_layer_kernel(%arg0: memref<16x64xf32, #tpu.memory_space<vmem>>, %arg1: memref<16x64xf32, #tpu.memory_space<vmem>>, %arg2: memref<16x64xf32, #tpu.memory_space<vmem>>, %arg3: memref<16x64xf32, #tpu.memory_space<vmem>>, %arg4: memref<16x64xf32, #tpu.memory_space<vmem>>, %arg5: memref<64x64xf32, #tpu.memory_space<vmem>>, %arg6: memref<64x192xbf16, #tpu.memory_space<vmem>>, %arg7: memref<64x64xbf16, #tpu.memory_space<vmem>>, %arg8: memref<1x64xf32, #tpu.memory_space<vmem>>, %arg9: memref<1x64xf32, #tpu.memory_space<vmem>>, %arg10: memref<64x256xbf16, #tpu.memory_space<vmem>>, %arg11: memref<128x64xbf16, #tpu.memory_space<vmem>>, %arg12: memref<16x64xf32, #tpu.memory_space<vmem>>) attributes {dimension_semantics = [], scalar_prefetch = 0 : i64, scratch_operands = 0 : i64, tpu.core_type = #tpu.core_type<tc>} {
    %c0 = arith.constant 0 : index
    %c0_0 = arith.constant 0 : index
    %0 = vector.load %arg0[%c0, %c0_0] : memref<16x64xf32, #tpu.memory_space<vmem>>, vector<16x64xf32>
    %c0_1 = arith.constant 0 : index
    %c0_2 = arith.constant 0 : index
    %1 = vector.load %arg5[%c0_1, %c0_2] : memref<64x64xf32, #tpu.memory_space<vmem>>, vector<64x64xf32>
    %c0_3 = arith.constant 0 : index
    %c0_4 = arith.constant 0 : index
    %2 = vector.load %arg2[%c0_3, %c0_4] : memref<16x64xf32, #tpu.memory_space<vmem>>, vector<16x64xf32>
    %c0_5 = arith.constant 0 : index
    %c0_6 = arith.constant 0 : index
    %3 = vector.load %arg3[%c0_5, %c0_6] : memref<16x64xf32, #tpu.memory_space<vmem>>, vector<16x64xf32>
    %c0_7 = arith.constant 0 : index
    %c0_8 = arith.constant 0 : index
    %4 = vector.load %arg4[%c0_7, %c0_8] : memref<16x64xf32, #tpu.memory_space<vmem>>, vector<16x64xf32>
    %c0_9 = arith.constant 0 : index
    %c0_10 = arith.constant 0 : index
    %5 = vector.load %arg8[%c0_9, %c0_10] : memref<1x64xf32, #tpu.memory_space<vmem>>, vector<1x64xf32>
    %6 = arith.mulf %0, %0 : vector<16x64xf32>
    %cst = arith.constant dense<0.000000e+00> : vector<16xf32>
    %7 = vector.multi_reduction <add>, %6, %cst [1] : vector<16x64xf32> to vector<16xf32>
    %8 = vector.shape_cast %7 : vector<16xf32> to vector<16x1xf32>
    %cst_11 = arith.constant 6.400000e+01 : f32
    %9 = vector.broadcast %cst_11 : f32 to vector<16x1xf32>
    %10 = arith.divf %8, %9 : vector<16x1xf32>
    %cst_12 = arith.constant 9.99999997E-7 : f32
    %11 = vector.broadcast %cst_12 : f32 to vector<16x1xf32>
    %12 = arith.addf %10, %11 : vector<16x1xf32>
    %13 = math.rsqrt %12 : vector<16x1xf32>
    %14 = vector.broadcast %13 : vector<16x1xf32> to vector<16x64xf32>
    %15 = arith.mulf %0, %14 : vector<16x64xf32>
    %cst_13 = arith.constant 1.000000e+00 : f32
    %16 = vector.broadcast %cst_13 : f32 to vector<1x64xf32>
    %17 = arith.addf %16, %5 : vector<1x64xf32>
    %18 = vector.broadcast %17 : vector<1x64xf32> to vector<16x64xf32>
    %19 = arith.mulf %15, %18 : vector<16x64xf32>
    %20 = arith.truncf %19 : vector<16x64xf32> to vector<16x64xbf16>
    %c0_14 = arith.constant 0 : index
    %c0_15 = arith.constant 0 : index
    %21 = vector.load %arg6[%c0_14, %c0_15] : memref<64x192xbf16, #tpu.memory_space<vmem>>, vector<64x192xbf16>
    %cst_16 = arith.constant dense<0.000000e+00> : vector<16x192xf32>
    %22 = tpu.matmul %20, %21, %cst_16 {dimension_numbers = #tpu.dot_dimension_numbers<[1], [0], [0], [1], [0, 0, 1, 1], [], []>} : vector<16x64xbf16>, vector<64x192xbf16>, vector<16x192xf32> -> vector<16x192xf32>
    %23 = vector.extract_strided_slice %22 {offsets = [0, 0], sizes = [16, 64], strides = [1, 1]} : vector<16x192xf32> to vector<16x64xf32>
    %24 = vector.extract_strided_slice %22 {offsets = [0, 64], sizes = [16, 64], strides = [1, 1]} : vector<16x192xf32> to vector<16x64xf32>
    %25 = vector.extract_strided_slice %22 {offsets = [0, 128], sizes = [16, 64], strides = [1, 1]} : vector<16x192xf32> to vector<16x64xf32>
    %26 = arith.mulf %23, %2 : vector<16x64xf32>
    %c56_i32 = arith.constant 56 : i32
    %27 = tpu.dynamic_rotate %23 by %c56_i32 dim 1 : vector<16x64xf32>, i32 -> vector<16x64xf32>
    %28 = arith.mulf %27, %3 : vector<16x64xf32>
    %29 = arith.addf %26, %28 : vector<16x64xf32>
    %c8_i32 = arith.constant 8 : i32
    %30 = tpu.dynamic_rotate %23 by %c8_i32 dim 1 : vector<16x64xf32>, i32 -> vector<16x64xf32>
    %31 = arith.mulf %30, %4 : vector<16x64xf32>
    %32 = arith.addf %29, %31 : vector<16x64xf32>
    %33 = arith.truncf %32 : vector<16x64xf32> to vector<16x64xbf16>
    %34 = arith.mulf %24, %2 : vector<16x64xf32>
    %c56_i32_17 = arith.constant 56 : i32
    %35 = tpu.dynamic_rotate %24 by %c56_i32_17 dim 1 : vector<16x64xf32>, i32 -> vector<16x64xf32>
    %36 = arith.mulf %35, %3 : vector<16x64xf32>
    %37 = arith.addf %34, %36 : vector<16x64xf32>
    %c8_i32_18 = arith.constant 8 : i32
    %38 = tpu.dynamic_rotate %24 by %c8_i32_18 dim 1 : vector<16x64xf32>, i32 -> vector<16x64xf32>
    %39 = arith.mulf %38, %4 : vector<16x64xf32>
    %40 = arith.addf %37, %39 : vector<16x64xf32>
    %41 = tpu.concatenate %40, %40, %40, %40 in 0 : vector<16x64xf32>, vector<16x64xf32>, vector<16x64xf32>, vector<16x64xf32> -> vector<64x64xf32>
    %42 = arith.mulf %41, %1 : vector<64x64xf32>
    %43 = arith.truncf %42 : vector<64x64xf32> to vector<64x64xbf16>
    %44 = tpu.concatenate %25, %25, %25, %25 in 0 : vector<16x64xf32>, vector<16x64xf32>, vector<16x64xf32>, vector<16x64xf32> -> vector<64x64xf32>
    %45 = arith.mulf %44, %1 : vector<64x64xf32>
    %46 = arith.truncf %45 : vector<64x64xf32> to vector<64x64xbf16>
    %cst_19 = arith.constant dense<0.000000e+00> : vector<16x64xf32>
    %47 = tpu.matmul %33, %43, %cst_19 {dimension_numbers = #tpu.dot_dimension_numbers<[1], [1], [0], [0], [0, 0, 1, 0], [], []>} : vector<16x64xbf16>, vector<64x64xbf16>, vector<16x64xf32> -> vector<16x64xf32>
    %c0_20 = arith.constant 0 : index
    %c0_21 = arith.constant 0 : index
    %48 = vector.load %arg1[%c0_20, %c0_21] : memref<16x64xf32, #tpu.memory_space<vmem>>, vector<16x64xf32>
    %49 = arith.addf %47, %48 : vector<16x64xf32>
    %cst_22 = arith.constant dense<0xFF800000> : vector<16xf32>
    %50 = vector.multi_reduction <maximumf>, %49, %cst_22 [1] : vector<16x64xf32> to vector<16xf32>
    %51 = vector.shape_cast %50 : vector<16xf32> to vector<16x1xf32>
    %52 = vector.broadcast %51 : vector<16x1xf32> to vector<16x64xf32>
    %53 = arith.subf %49, %52 : vector<16x64xf32>
    %54 = math.exp %53 : vector<16x64xf32>
    %cst_23 = arith.constant dense<0.000000e+00> : vector<16x64xf32>
    %55 = tpu.matmul %54, %1, %cst_23 {dimension_numbers = #tpu.dot_dimension_numbers<[1], [0], [0], [1], [0, 0, 1, 1], [], []>} : vector<16x64xf32>, vector<64x64xf32>, vector<16x64xf32> -> vector<16x64xf32>
    %56 = tpu.reciprocal %55 {approx = true} : vector<16x64xf32> -> vector<16x64xf32>
    %57 = arith.mulf %54, %56 : vector<16x64xf32>
    %58 = arith.truncf %57 : vector<16x64xf32> to vector<16x64xbf16>
    %cst_24 = arith.constant dense<0.000000e+00> : vector<16x64xf32>
    %59 = tpu.matmul %58, %46, %cst_24 {dimension_numbers = #tpu.dot_dimension_numbers<[1], [0], [0], [1], [0, 0, 1, 1], [], []>} : vector<16x64xbf16>, vector<64x64xbf16>, vector<16x64xf32> -> vector<16x64xf32>
    %60 = arith.truncf %59 : vector<16x64xf32> to vector<16x64xbf16>
    %c0_25 = arith.constant 0 : index
    %c0_26 = arith.constant 0 : index
    %61 = vector.load %arg7[%c0_25, %c0_26] : memref<64x64xbf16, #tpu.memory_space<vmem>>, vector<64x64xbf16>
    %cst_27 = arith.constant dense<0.000000e+00> : vector<16x64xf32>
    %62 = tpu.matmul %60, %61, %cst_27 {dimension_numbers = #tpu.dot_dimension_numbers<[1], [0], [0], [1], [0, 0, 1, 1], [], []>} : vector<16x64xbf16>, vector<64x64xbf16>, vector<16x64xf32> -> vector<16x64xf32>
    %63 = arith.addf %0, %62 : vector<16x64xf32>
    %c0_28 = arith.constant 0 : index
    %c0_29 = arith.constant 0 : index
    %64 = vector.load %arg9[%c0_28, %c0_29] : memref<1x64xf32, #tpu.memory_space<vmem>>, vector<1x64xf32>
    %65 = arith.mulf %63, %63 : vector<16x64xf32>
    %cst_30 = arith.constant dense<0.000000e+00> : vector<16xf32>
    %66 = vector.multi_reduction <add>, %65, %cst_30 [1] : vector<16x64xf32> to vector<16xf32>
    %67 = vector.shape_cast %66 : vector<16xf32> to vector<16x1xf32>
    %cst_31 = arith.constant 6.400000e+01 : f32
    %68 = vector.broadcast %cst_31 : f32 to vector<16x1xf32>
    %69 = arith.divf %67, %68 : vector<16x1xf32>
    %cst_32 = arith.constant 9.99999997E-7 : f32
    %70 = vector.broadcast %cst_32 : f32 to vector<16x1xf32>
    %71 = arith.addf %69, %70 : vector<16x1xf32>
    %72 = math.rsqrt %71 : vector<16x1xf32>
    %73 = vector.broadcast %72 : vector<16x1xf32> to vector<16x64xf32>
    %74 = arith.mulf %63, %73 : vector<16x64xf32>
    %cst_33 = arith.constant 1.000000e+00 : f32
    %75 = vector.broadcast %cst_33 : f32 to vector<1x64xf32>
    %76 = arith.addf %75, %64 : vector<1x64xf32>
    %77 = vector.broadcast %76 : vector<1x64xf32> to vector<16x64xf32>
    %78 = arith.mulf %74, %77 : vector<16x64xf32>
    %79 = arith.truncf %78 : vector<16x64xf32> to vector<16x64xbf16>
    %c0_34 = arith.constant 0 : index
    %c0_35 = arith.constant 0 : index
    %80 = vector.load %arg10[%c0_34, %c0_35] : memref<64x256xbf16, #tpu.memory_space<vmem>>, vector<64x256xbf16>
    %cst_36 = arith.constant dense<0.000000e+00> : vector<16x256xf32>
    %81 = tpu.matmul %79, %80, %cst_36 {dimension_numbers = #tpu.dot_dimension_numbers<[1], [0], [0], [1], [0, 0, 1, 1], [], []>} : vector<16x64xbf16>, vector<64x256xbf16>, vector<16x256xf32> -> vector<16x256xf32>
    %82 = vector.extract_strided_slice %81 {offsets = [0, 0], sizes = [16, 128], strides = [1, 1]} : vector<16x256xf32> to vector<16x128xf32>
    %83 = vector.extract_strided_slice %81 {offsets = [0, 128], sizes = [16, 128], strides = [1, 1]} : vector<16x256xf32> to vector<16x128xf32>
    %cst_37 = arith.constant 5.000000e-01 : f32
    %84 = vector.broadcast %cst_37 : f32 to vector<16x128xf32>
    %85 = arith.mulf %84, %82 : vector<16x128xf32>
    %cst_38 = arith.constant 4.471500e-02 : f32
    %86 = vector.broadcast %cst_38 : f32 to vector<16x128xf32>
    %87 = arith.mulf %86, %82 : vector<16x128xf32>
    %88 = arith.mulf %87, %82 : vector<16x128xf32>
    %89 = arith.mulf %88, %82 : vector<16x128xf32>
    %90 = arith.addf %82, %89 : vector<16x128xf32>
    %cst_39 = arith.constant 0.797884583 : f32
    %91 = vector.broadcast %cst_39 : f32 to vector<16x128xf32>
    %92 = arith.mulf %91, %90 : vector<16x128xf32>
    %93 = math.tanh %92 : vector<16x128xf32>
    %cst_40 = arith.constant 1.000000e+00 : f32
    %94 = vector.broadcast %cst_40 : f32 to vector<16x128xf32>
    %95 = arith.addf %94, %93 : vector<16x128xf32>
    %96 = arith.mulf %85, %95 : vector<16x128xf32>
    %97 = arith.mulf %96, %83 : vector<16x128xf32>
    %98 = arith.truncf %97 : vector<16x128xf32> to vector<16x128xbf16>
    %c0_41 = arith.constant 0 : index
    %c0_42 = arith.constant 0 : index
    %99 = vector.load %arg11[%c0_41, %c0_42] : memref<128x64xbf16, #tpu.memory_space<vmem>>, vector<128x64xbf16>
    %cst_43 = arith.constant dense<0.000000e+00> : vector<16x64xf32>
    %100 = tpu.matmul %98, %99, %cst_43 {dimension_numbers = #tpu.dot_dimension_numbers<[1], [0], [0], [1], [0, 0, 1, 1], [], []>} : vector<16x128xbf16>, vector<128x64xbf16>, vector<16x64xf32> -> vector<16x64xf32>
    %101 = arith.addf %63, %100 : vector<16x64xf32>
    %c0_44 = arith.constant 0 : index
    %c0_45 = arith.constant 0 : index
    %102 = vector.load %arg12[%c0_44, %c0_45] : memref<16x64xf32, #tpu.memory_space<vmem>>, vector<16x64xf32>
    tpu.vector_store %arg12[%c0_44, %c0_45], %101 {strides = array<i32>} : memref<16x64xf32, #tpu.memory_space<vmem>>, vector<16x64xf32>,
    return
  }
}

</mosaic_0001>

<bundles_post_ra>
// kernel: mul.10
= control target key start
LH: loop header
LB: loop body
LE: loop exit
PB: predicated region body
PF: predicated region fallthrough
CT: control target
= control target key end

     0   :  { %vm7_vm0 = vcmask 64512   ;;  %vm13_vm1 = vcmask 130112   ;;  %s39_s0 = inlined_call_operand.vmem [shape: f32[2,8], index: 0, kind: input, shape index: {}]   ;;  %s40_s1 = inlined_call_operand.vmem [shape: f32[16], index: 1, kind: output, shape index: {}]  }
   0x1   :  { %v4_v0 = vld [vmem:[%s39_s0] sm:$0x3]  ;;  %s22_s0 = smov 8  }
   0x2   :  { %5 = vst [vmem:[#allocation1] sm:$0x3] %v4_v0 }
   0x9   :  { %v10_v1 = vld [vmem:[#allocation1 + $0x1] sm:$0x1]   ;;  %v6_v2 = vld [vmem:[#allocation1] sm:$0x1]  }
   0xa   :  { %11 = vrot.lane.b32.xlu0 %v10_v1, %s22_s0  ;;  %8 = vst.msk [vmem:[#allocation0] sm:$0x1] %vm7_vm0, %v6_v2  }
  0x7c   :  { %v12_v3 = vpop.permute.xlu0 %11  }
  0x7d   :  { %14 = vst.msk [vmem:[#allocation0] sm:$0x1] %vm13_vm1, %v12_v3  }
  0x84   :  { %v18_v4 = vld [vmem:[#allocation0] sm:$0x1] }
  0x85   :  { %20 = vst [vmem:[%s40_s1] sm:$0x1] %v18_v4 }

// kernel: tile.23
= control target key start
LH: loop header
LB: loop body
LE: loop exit
PB: predicated region body
PF: predicated region fallthrough
CT: control target
= control target key end

     0   :  { %vm82_vm0 = vcmask 1047556   ;;  %vm84_vm1 = vcmask 130048   ;;  %s195_s9 = smov 48   ;;  %s196_s14 = smov 16   ;;  %vm103_vm2 = vcmask 523648   ;;  %vm124_vm3 = vcmask 392448   ;;  %s289_s0 = inlined_call_operand.vmem [shape: f32[16,4,16], index: 0, kind: input, shape index: {}]   ;;  %s290_s1 = inlined_call_operand.vmem [shape: f32[16,64], index: 1, kind: output, shape index: {}]  }
   0x1   :  { %v180_v0 = vld [vmem:[%s289_s0 + $0x1c] sm:$0xf]  ;;  %v181_v1 = vld [vmem:[%s289_s0 + $0x18] sm:$0xf]  ;;  %v182_v2 = vld [vmem:[%s289_s0 + $0x14] sm:$0xf] }
   0x2   :  { %48 = vst [vmem:[#allocation0 + $0x38] sm:$0xf] %v180_v0  ;;  %53 = vst [vmem:[#allocation0 + $0x30] sm:$0xf] %v181_v1  ;;  %v183_v3 = vld [vmem:[%s289_s0 + $0x10] sm:$0xf] }
   0x3   :  { %58 = vst [vmem:[#allocation0 + $0x28] sm:$0xf] %v182_v2  ;;  %v184_v4 = vld [vmem:[%s289_s0 + $0xc] sm:$0xf]  ;;  %v185_v5 = vld [vmem:[%s289_s0 + $0x8] sm:$0xf] }
   0x4   :  { %63 = vst [vmem:[#allocation0 + $0x20] sm:$0xf] %v183_v3  ;;  %68 = vst [vmem:[#allocation0 + $0x18] sm:$0xf] %v184_v4  ;;  %v186_v6 = vld [vmem:[%s289_s0 + $0x4] sm:$0xf] }
   0x5   :  { %73 = vst [vmem:[#allocation0 + $0x10] sm:$0xf] %v185_v5  ;;  %v78_v7 = vld [vmem:[%s289_s0] sm:$0xf]  ;;  %77 = vst [vmem:[#allocation0 + $0x8] sm:$0xf] %v186_v6 }
   0x6   :  { %79 = vst [vmem:[#allocation0] sm:$0xf] %v78_v7  ;;  %v172_v8 = vld [vmem:[%s289_s0 + $0x3c] sm:$0xf]  ;;  %v173_v9 = vld [vmem:[%s289_s0 + $0x38] sm:$0xf] }
   0x7   :  { %8 = vst [vmem:[#allocation0 + $0x78] sm:$0xf] %v172_v8  ;;  %13 = vst [vmem:[#allocation0 + $0x70] sm:$0xf] %v173_v9  ;;  %v174_v10 = vld [vmem:[%s289_s0 + $0x34] sm:$0xf] }
   0x8   :  { %v175_v11 = vld [vmem:[%s289_s0 + $0x30] sm:$0xf]  ;;  %v176_v12 = vld [vmem:[%s289_s0 + $0x2c] sm:$0xf]  ;;  %18 = vst [vmem:[#allocation0 + $0x68] sm:$0xf] %v174_v10 }
   0x9   :  { %23 = vst [vmem:[#allocation0 + $0x60] sm:$0xf] %v175_v11  ;;  %28 = vst [vmem:[#allocation0 + $0x58] sm:$0xf] %v176_v12  ;;  %v177_v13 = vld [vmem:[%s289_s0 + $0x28] sm:$0xf] }
   0xa   :  { %v178_v14 = vld [vmem:[%s289_s0 + $0x24] sm:$0xf]  ;;  %v179_v15 = vld [vmem:[%s289_s0 + $0x20] sm:$0xf]  ;;  %33 = vst [vmem:[#allocation0 + $0x50] sm:$0xf] %v177_v13 }
   0xb   :  { %38 = vst [vmem:[#allocation0 + $0x48] sm:$0xf] %v178_v14  ;;  %43 = vst [vmem:[#allocation0 + $0x40] sm:$0xf] %v179_v15  ;;  %s194_s0 = smov 32   ;;  %vm145_vm4 = vcmask 261248  }
   0xc   :  { %v119_v16 = vld [vmem:[#allocation0 + $0x2] ss:$8 sm:$0xf0]   ;;  %v98_v17 = vld [vmem:[#allocation0 + $0x3] ss:$8 sm:$0xf0]  }
   0xd   :  { %v117_v18 = vld [vmem:[#allocation0 + $0x2] ss:$8 sm:$0xf]   ;;  %v96_v19 = vld [vmem:[#allocation0 + $0x3] ss:$8 sm:$0xf]  }
   0xe   :  { %v121_v20 = vsel %vm82_vm0, %v119_v16, %v117_v18  ;;  %v100_v21 = vsel %vm82_vm0, %v98_v17, %v96_v19  ;;  %v138_v24 = vld [vmem:[#allocation0 + $0x1] ss:$8 sm:$0xf]   ;;  %v80_v32 = vld [vmem:[#allocation0] ss:$8 sm:$0xf]  }
   0xf   :  { %122 = vrot.lane.b32.xlu1 %v121_v20, %s194_s0  ;;  %101 = vrot.lane.b32.xlu0 %v100_v21, %s195_s9  ;;  %v140_v25 = vld [vmem:[#allocation0 + $0x1] ss:$8 sm:$0xf0]   ;;  %v81_v33 = vld [vmem:[#allocation0] ss:$8 sm:$0xf0]  }
  0x10   :  { %v129_v22 = vld [vmem:[#allocation0 + $0x42] ss:$8 sm:$0xf0]   ;;  %v108_v23 = vld [vmem:[#allocation0 + $0x43] ss:$8 sm:$0xf0]   ;;  %v83_v34 = vsel %vm82_vm0, %v81_v33, %v80_v32  ;;  %v142_v38 = vsel %vm82_vm0, %v140_v25, %v138_v24 }
  0x11   :  { %v150_v31 = vld [vmem:[#allocation0 + $0x41] ss:$8 sm:$0xf0]   ;;  %v89_v36 = vld [vmem:[#allocation0 + $0x40] ss:$8 sm:$0xf0]  }
  0x12   :  { %v127_v26 = vld [vmem:[#allocation0 + $0x42] ss:$8 sm:$0xf]   ;;  %v106_v27 = vld [vmem:[#allocation0 + $0x43] ss:$8 sm:$0xf]  }
  0x13   :  { %v131_v28 = vsel %vm82_vm0, %v129_v22, %v127_v26  ;;  %v110_v29 = vsel %vm82_vm0, %v108_v23, %v106_v27  ;;  %v148_v30 = vld [vmem:[#allocation0 + $0x41] ss:$8 sm:$0xf]   ;;  %v87_v35 = vld [vmem:[#allocation0 + $0x40] ss:$8 sm:$0xf]  }
  0x14   :  { %132 = vrot.lane.b32.xlu1 %v131_v28, %s194_s0  ;;  %111 = vrot.lane.b32.xlu0 %v110_v29, %s195_s9  ;;  %v152_v37 = vsel %vm82_vm0, %v150_v31, %v148_v30  ;;  %85 = vst.msk [vmem:[%s290_s1] sm:$0xff] %vm84_vm1, %v83_v34   ;;  %v91_v39 = vsel %vm82_vm0, %v89_v36, %v87_v35 }
  0x15   :  { %187 = vst.msk [vmem:[%s290_s1 + $0x8] sm:$0xff] %vm84_vm1, %v91_v39  }
  0x18   :  { %153 = vrot.lane.b32.xlu1 %v152_v37, %s196_s14  ;;  %143 = vrot.lane.b32.xlu0 %v142_v38, %s196_s14 }
  0x81   :  { %v123_v40 = vpop.permute.xlu1 %122   ;;  %v102_v41 = vpop.permute.xlu0 %101  }
  0x82   :  { %104 = vst.msk [vmem:[%s290_s1] sm:$0xff] %vm103_vm2, %v102_v41  }
  0x83   :  { %125 = vst.msk [vmem:[%s290_s1] sm:$0xff] %vm124_vm3, %v123_v40  }
  0x86   :  { %v133_v42 = vpop.permute.xlu1 %132   ;;  %v112_v43 = vpop.permute.xlu0 %111  }
  0x87   :  { %188 = vst.msk [vmem:[%s290_s1 + $0x8] sm:$0xff] %vm103_vm2, %v112_v43  }
  0x88   :  { %189 = vst.msk [vmem:[%s290_s1 + $0x8] sm:$0xff] %vm124_vm3, %v133_v42  }
  0x8a   :  { %v154_v44 = vpop.permute.xlu1 %153   ;;  %v144_v45 = vpop.permute.xlu0 %143  }
  0x8b   :  { %190 = vst.msk [vmem:[%s290_s1 + $0x8] sm:$0xff] %vm145_vm4, %v154_v44   ;;  %146 = vst.msk [vmem:[%s290_s1] sm:$0xff] %vm145_vm4, %v144_v45  }

// kernel: gemma_decoder_layer.1
= control target key start
LH: loop header
LB: loop body
LE: loop exit
PB: predicated region body
PF: predicated region fallthrough
CT: control target
= control target key end

     0   :  { %vm62_vm0 = vcmask 523264   ;;  %s1624_s0 = inlined_call_operand.vmem [shape: f32[16,64], index: 0, kind: input, shape index: {}]   ;;  %s1625_s1 = inlined_call_operand.vmem [shape: f32[16,64], index: 1, kind: input, shape index: {}]   ;;  %s1626_s2 = inlined_call_operand.vmem [shape: f32[16,64], index: 2, kind: input, shape index: {}]   ;;  %s1627_s3 = inlined_call_operand.vmem [shape: f32[16,64], index: 3, kind: input, shape index: {}]   ;;  %s1628_s4 = inlined_call_operand.vmem [shape: f32[16,64], index: 4, kind: input, shape index: {}]   ;;  %s1629_s5 = inlined_call_operand.vmem [shape: f32[64,64], index: 5, kind: input, shape index: {}]   ;;  %s1630_s6 = inlined_call_operand.vmem [shape: bf16[64,192], index: 6, kind: input, shape index: {}]   ;;  %s1631_s7 = inlined_call_operand.vmem [shape: bf16[64,64], index: 7, kind: input, shape index: {}]   ;;  %s1632_s8 = inlined_call_operand.vmem [shape: f32[1,64], index: 8, kind: input, shape index: {}]   ;;  %s1633_s9 = inlined_call_operand.vmem [shape: f32[1,64], index: 9, kind: input, shape index: {}]   ;;  %s1634_s10 = inlined_call_operand.vmem [shape: bf16[64,256], index: 10, kind: input, shape index: {}]   ;;  %s1635_s11 = inlined_call_operand.vmem [shape: bf16[128,64], index: 11, kind: input, shape index: {}]   ;;  %s1636_s12 = inlined_call_operand.hbm [shape: f32[16,64], index: 12, kind: output, shape index: {}]  }
   0x1   :  { %v1234_v0 = vld [vmem:[%s1624_s0] sm:$0xff]  ;;  %v1239_v1 = vld [vmem:[%s1624_s0 + $0x8] sm:$0xff] }
   0x2   :  { %v60_v2 = vmul.f32 %v1234_v0, %v1234_v0  ;;  %v61_v3 = vmul.f32 %v1239_v1, %v1239_v1 }
   0x4   :  { %v63_v4 = vsel %vm62_vm0, %v60_v2, 0.0  ;;  %v66_v5 = vsel %vm62_vm0, %v61_v3, 0.0 }
   0x5   :  { %64 = vadd.xlane.f32.xlu0 %v63_v4 }
   0x9   :  { %67 = vadd.xlane.f32.xlu0 %v66_v5 }
   0xa   :  { %17 = vsyncpa [#allocation3], 0  ;;  %v1076_v6 = vld [vmem:[%s1630_s6 + $0x4] ss:$8 sps:$4 sm:$0xff]   ;;  %v1078_v7 = vld [vmem:[%s1630_s6] ss:$8 sps:$4 sm:$0xff]   ;;  %v80_v20 = vlaneseq }
   0xb   :  { %v1079_v8 = vld [vmem:[%s1630_s6 + $0x14] ss:$8 sps:$4 sm:$0xff]   ;;  %139 = vmatprep.subr.bf16.mxu0 %v1076_v6  ;;  %v1081_v9 = vld [vmem:[%s1630_s6 + $0x10] ss:$8 sps:$4 sm:$0xff]   ;;  %v1082_v10 = vld [vmem:[%s1630_s6 + $0x24] ss:$8 sps:$4 sm:$0xff]  }
   0xc   :  { %140 = vmatpush1.bf16.msra.mxu0 %v1078_v7  ;;  %v1156_v11 = vmov 0   ;;  %v1084_v12 = vld [vmem:[%s1630_s6 + $0x20] ss:$8 sps:$4 sm:$0xff]   ;;  %v1085_v13 = vld [vmem:[%s1630_s6 + $0x34] ss:$8 sps:$4 sm:$0xff]   ;;  %v1272_v22 = vshrl.u32 %v80_v20, 7 }
   0xd   :  { %141 = vmatprep.subr.bf16.mxu0 %v1079_v8  ;;  %171 = vmatprep.mubr.bf16.mxu0 %v1156_v11  ;;  %v1087_v14 = vld [vmem:[%s1630_s6 + $0x30] ss:$8 sps:$4 sm:$0xff]   ;;  %v59_v23 = vld [vmem:[%s1632_s8] sm:$0x1]  ;;  %v1298_v37 = vld [vmem:[%s1629_s5 + $0x8] sm:$0xff]  ;;  %s1157_s13 = smov 64  }
   0xe   :  { %v78_v24 = vadd.f32 1.0, %v59_v23  ;;  %v82_v25 = vsub.s32 0, %v1272_v22  ;;  %v1286_v34 = vld [vmem:[%s1629_s5] sm:$0xff]  ;;  %v1291_v35 = vld [vmem:[%s1629_s5 + $0x10] sm:$0xff]  ;;  %v1315_v41 = vld [vmem:[%s1629_s5 + $0x18] sm:$0xff]  ;;  %s1158_s21 = smov 56  }
   0xf   :  { %v1303_v38 = vld [vmem:[%s1629_s5 + $0x20] sm:$0xff]  ;;  %v1308_v39 = vld [vmem:[%s1629_s5 + $0x30] sm:$0xff]  ;;  %v1320_v42 = vld [vmem:[%s1629_s5 + $0x28] sm:$0xff]  ;;  %s1159_s6 = smov 8   ;;  %vm184_vm1 = vcmask 1048064   ;;  %vm1161_vm2 = vmmov 0  }
  0x10   :  { %142 = vmatpush1.bf16.msra.mxu0 %v1081_v9  ;;  %v83_v28 = vrot.slane %v78_v24, %v82_v25  ;;  %v1325_v43 = vld [vmem:[%s1629_s5 + $0x38] sm:$0xff]  ;;  %v58_v59 = vld [vmem:[%s1628_s4 + $0x8] sm:$0xff]  ;;  %v55_v61 = vld [vmem:[%s1627_s3] sm:$0xff] }
  0x11   :  { %143 = vmatprep.subr.bf16.mxu0 %v1082_v10  ;;  %v56_v62 = vld [vmem:[%s1627_s3 + $0x8] sm:$0xff]  ;;  %v57_v6 = vld [vmem:[%s1628_s4] sm:$0xff]  ;;  %s1163_s4 = smov 72  }
  0x12   :  { %v1381_v63 = vld [vmem:[%s1626_s2 + $0x8] sm:$0xff]  ;;  %v1399_v7 = vld [vmem:[%s1626_s2] sm:$0xff]  ;;  %s1162_s2 = smov 120  }
  0x13   :  { %v1105_v22 = vld [vmem:[%s1635_s11 + $0x8] sm:$0xff]  }
  0x14   :  { %144 = vmatpush1.bf16.msra.mxu0 %v1084_v12 }
  0x15   :  { %145 = vmatprep.subr.bf16.mxu0 %v1085_v13 }
  0x18   :  { %146 = vmatpush1.bf16.msra.mxu0 %v1087_v14 }
  0x92   :  { %v65_v15 = vpop.xlane.xlu0 %64 }
  0x93   :  { %v70_v16 = vmul.f32 0.015625, %v65_v15 }
  0x95   :  { %v72_v17 = vadd.f32 1e-06, %v70_v16 }
  0x96   :  { %v68_v18 = vpop.xlane.xlu0 %67 }
  0x97   :  { %1112 = vrsqrt.f32 %v72_v17  ;;  %v71_v19 = vmul.f32 0.015625, %v68_v18 }
  0x99   :  { %v73_v21 = vadd.f32 1e-06, %v71_v19 }
  0x9b   :  { %1114 = vrsqrt.f32 %v73_v21 }
  0xa1   :  { %v1113_v26 = vpop.eup %1112 }
  0xa2   :  { %v76_v27 = vmul.f32 %v1113_v26, %v1234_v0 }
  0xa4   :  { %v85_v31 = vmul.f32 %v83_v28, %v76_v27 }
  0xa5   :  { %v1115_v29 = vpop.eup %1114 }
  0xa6   :  { %v77_v30 = vmul.f32 %v1115_v29, %v1239_v1 }
  0xa8   :  { %v86_v32 = vmul.f32 %v83_v28, %v77_v30 }
  0xaa   :  { %v87_v33 = vpack.c.bf16 %v86_v32, %v85_v31  ;;  %v1160_v31 = vmov 0.0  }
  0xab   :  { %975 = vmatprep.subr.bf16.mxu1 %v1160_v31  ;;  %983 = vmatprep.mubr.msk.bf16.mxu1 %vm1161_vm2, %v1160_v31 }
  0xac   :  { %914 = vmatmul.mubr.msk.bf16.vlgmr.msra.gmra.mrb[0].mxu0 %vm62_vm0, %v87_v33 }
 0x17f   :  { %v1293_v36 = vpop.f32.mrb[0].mxu0 }
 0x180   :  { %250 = vrot.lane.b32.xlu1 %v1293_v36, %s1157_s13  ;;  %v175_v40 = vpop.f32.mrb[1].mxu0 }
 0x181   :  { %v1327_v44 = vpop.f32.mrb[2].mxu0  ;;  %v1330_v46 = vmul.f32 %v175_v40, %v1286_v34  ;;  %v1333_v47 = vmul.f32 %v175_v40, %v1291_v35  ;;  %v1336_v48 = vmul.f32 %v175_v40, %v1303_v38  ;;  %v1339_v49 = vmul.f32 %v175_v40, %v1308_v39 }
 0x182   :  { %v179_v45 = vpop.f32.mrb[3].mxu0 }
 0x183   :  { %v1342_v50 = vmul.f32 %v179_v45, %v1298_v37  ;;  %v1345_v51 = vmul.f32 %v179_v45, %v1315_v41  ;;  %v1348_v52 = vmul.f32 %v179_v45, %v1320_v42  ;;  %v1351_v53 = vmul.f32 %v179_v45, %v1325_v43 }
 0x184   :  { %252 = vrot.lane.b32.xlu1 %v1327_v44, %s1157_s13 }
 0x185   :  { %v344_v54 = vpack.c.bf16 %v1342_v50, %v1330_v46  ;;  %v345_v55 = vpack.c.bf16 %v1345_v51, %v1333_v47  ;;  %v346_v56 = vpack.c.bf16 %v1348_v52, %v1336_v48  ;;  %v347_v57 = vpack.c.bf16 %v1351_v53, %v1339_v49  ;;  %v1091_v53 = vld [vmem:[%s1631_s7 + $0x18] sm:$0xff]  }
 0x1f2   :  { %v251_v58 = vpop.permute.xlu1 %250 }
 0x1f3   :  { %256 = vrot.lane.b32.xlu0 %v251_v58, %s1157_s13 }
 0x1f6   :  { %v253_v60 = vpop.permute.xlu1 %252 }
 0x1f7   :  { %221 = vrot.lane.b32.xlu0 %v58_v59, %s1158_s21  ;;  %259 = vrot.lane.b32.xlu1 %v253_v60, %s1157_s13 }
 0x1fb   :  { %188 = vrot.lane.b32.xlu0 %v1327_v44, %s1157_s13  ;;  %199 = vrot.lane.b32.xlu1 %v55_v61, %s1159_s6 }
 0x1ff   :  { %242 = vrot.lane.b32.xlu0 %v1381_v63, %s1157_s13  ;;  %201 = vrot.lane.b32.xlu1 %v56_v62, %s1159_s6 }
 0x265   :  { %v257_v2 = vpop.permute.xlu0 %256 }
 0x266   :  { %v258_v3 = vsel %vm184_vm1, %v257_v2, %v251_v58 }
 0x267   :  { %262 = vrot.lane.b32.xlu1 %v258_v3, %s1157_s13 }
 0x269   :  { %v260_v4 = vpop.permute.xlu1 %259  ;;  %v1415_v18 = vpop.permute.xlu0 %221 }
 0x26a   :  { %v261_v5 = vsel %vm184_vm1, %v260_v4, %v253_v60 }
 0x26b   :  { %264 = vrot.lane.b32.xlu1 %v261_v5, %s1157_s13 }
 0x26d   :  { %v1403_v8 = vpop.permute.xlu1 %199  ;;  %v189_v23 = vpop.permute.xlu0 %188 }
 0x26e   :  { %v190_v26 = vsel %vm184_vm1, %v189_v23, %v1327_v44 }
 0x26f   :  { %219 = vrot.lane.b32.xlu1 %v57_v6, %s1158_s21 }
 0x271   :  { %v1405_v9 = vpop.permute.xlu1 %201  ;;  %v243_v28 = vpop.permute.xlu0 %242 }
 0x272   :  { %v247_v33 = vmul.f32 %v243_v28, %v1327_v44 }
 0x273   :  { %185 = vrot.lane.b32.xlu1 %v1293_v36, %s1157_s13 }
 0x277   :  { %240 = vrot.lane.b32.xlu1 %v1399_v7, %s1157_s13 }
 0x2d9   :  { %v263_v10 = vpop.permute.xlu1 %262 }
 0x2da   :  { %v266_v12 = vsel %vm184_vm1, %v263_v10, %v251_v58 }
 0x2db   :  { %v268_v13 = vmul.f32 %v266_v12, %v1403_v8 }
 0x2dd   :  { %272 = vrot.lane.b32.xlu1 %v268_v13, %s1158_s21  ;;  %v265_v14 = vpop.permute.xlu1 %264 }
 0x2de   :  { %v267_v15 = vsel %vm184_vm1, %v265_v14, %v253_v60 }
 0x2df   :  { %v269_v16 = vmul.f32 %v267_v15, %v1405_v9  ;;  %v281_v20 = vmul.f32 %v267_v15, %v1415_v18 }
 0x2e1   :  { %274 = vrot.lane.b32.xlu0 %v269_v16, %s1158_s21  ;;  %v1413_v17 = vpop.permute.xlu1 %219 }
 0x2e2   :  { %v280_v19 = vmul.f32 %v266_v12, %v1413_v17 }
 0x2e4   :  { %284 = vrot.lane.b32.xlu1 %v280_v19, %s1159_s6 }
 0x2e5   :  { %286 = vrot.lane.b32.xlu0 %v281_v20, %s1159_s6  ;;  %v186_v21 = vpop.permute.xlu1 %185 }
 0x2e6   :  { %v187_v24 = vsel %vm184_vm1, %v186_v21, %v1293_v36 }
 0x2e8   :  { %300 = vrot.lane.b32.xlu1 %v1286_v34, %s1157_s13 }
 0x2e9   :  { %302 = vrot.lane.b32.xlu0 %v1298_v37, %s1157_s13  ;;  %v241_v27 = vpop.permute.xlu1 %240 }
 0x2ea   :  { %v246_v32 = vmul.f32 %v241_v27, %v1293_v36 }
 0x2ec   :  { %304 = vrot.lane.b32.xlu1 %v1291_v35, %s1157_s13 }
 0x2ed   :  { %306 = vrot.lane.b32.xlu0 %v1315_v41, %s1157_s13 }
 0x2f0   :  { %308 = vrot.lane.b32.xlu1 %v1303_v38, %s1157_s13 }
 0x2f1   :  { %310 = vrot.lane.b32.xlu0 %v1320_v42, %s1157_s13 }
 0x2f4   :  { %312 = vrot.lane.b32.xlu1 %v1308_v39, %s1157_s13 }
 0x2f5   :  { %314 = vrot.lane.b32.xlu0 %v1325_v43, %s1157_s13 }
 0x2f8   :  { %191 = vrot.lane.b32.xlu1 %v187_v24, %s1157_s13 }
 0x2f9   :  { %193 = vrot.lane.b32.xlu0 %v190_v26, %s1157_s13 }
 0x34f   :  { %v273_v29 = vpop.permute.xlu1 %272 }
 0x350   :  { %v278_v45 = vadd.f32 %v273_v29, %v246_v32 }
 0x353   :  { %v275_v30 = vpop.permute.xlu0 %274 }
 0x354   :  { %v279_v59 = vadd.f32 %v275_v30, %v247_v33 }
 0x356   :  { %v285_v40 = vpop.permute.xlu1 %284 }
 0x357   :  { %v287_v58 = vpop.permute.xlu0 %286  ;;  %v290_v60 = vadd.f32 %v285_v40, %v278_v45 }
 0x358   :  { %v291_v61 = vadd.f32 %v287_v58, %v279_v59 }
 0x35a   :  { %v301_v62 = vpop.permute.xlu1 %300 }
 0x35b   :  { %v324_v2 = vmul.f32 %v301_v62, %v290_v60  ;;  %v303_v3 = vpop.permute.xlu0 %302 }
 0x35c   :  { %v325_v4 = vmul.f32 %v303_v3, %v291_v61 }
 0x35e   :  { %v332_v5 = vpack.c.bf16 %v325_v4, %v324_v2  ;;  %v305_v6 = vpop.permute.xlu1 %304  ;;  %v182_v4 = vmul.f32 %v1293_v36, %v1399_v7 }
 0x35f   :  { %v326_v10 = vmul.f32 %v305_v6, %v290_v60  ;;  %v307_v12 = vpop.permute.xlu0 %306 }
 0x360   :  { %v327_v13 = vmul.f32 %v307_v12, %v291_v61  ;;  %354 = vrot.lane.b32.xlu1 %v332_v5, %s1157_s13  ;;  %v183_v5 = vmul.f32 %v1327_v44, %v1381_v63  ;;  %v349_v63 = vld [vmem:[%s1625_s1 + $0x8] sm:$0xff] }
 0x362   :  { %v333_v14 = vpack.c.bf16 %v327_v13, %v326_v10  ;;  %v309_v15 = vpop.permute.xlu1 %308 }
 0x363   :  { %v328_v16 = vmul.f32 %v309_v15, %v290_v60  ;;  %v311_v19 = vpop.permute.xlu0 %310 }
 0x364   :  { %v329_v20 = vmul.f32 %v311_v19, %v291_v61  ;;  %356 = vrot.lane.b32.xlu0 %v333_v14, %s1157_s13 }
 0x366   :  { %v334_v21 = vpack.c.bf16 %v329_v20, %v328_v16  ;;  %v313_v23 = vpop.permute.xlu1 %312 }
 0x367   :  { %v330_v24 = vmul.f32 %v313_v23, %v290_v60  ;;  %v315_v26 = vpop.permute.xlu0 %314 }
 0x368   :  { %v331_v27 = vmul.f32 %v315_v26, %v291_v61  ;;  %358 = vrot.lane.b32.xlu1 %v334_v21, %s1157_s13 }
 0x36a   :  { %v335_v28 = vpack.c.bf16 %v331_v27, %v330_v24  ;;  %v192_v29 = vpop.permute.xlu1 %191 }
 0x36b   :  { %v195_v30 = vsel %vm184_vm1, %v192_v29, %v1293_v36  ;;  %v194_v32 = vpop.permute.xlu0 %193  ;;  %v348_v36 = vld [vmem:[%s1625_s1] sm:$0xff]  ;;  %v1054_v29 = vpack.c.bf16 %v1315_v41, %v1291_v35 }
 0x36c   :  { %v205_v33 = vmul.f32 %v1403_v8, %v195_v30  ;;  %v196_v40 = vsel %vm184_vm1, %v194_v32, %v1327_v44  ;;  %v225_v58 = vmul.f32 %v1413_v17, %v195_v30  ;;  %v1058_v30 = vpack.c.bf16 %v1320_v42, %v1303_v38  ;;  %v1089_v42 = vld [vmem:[%s1631_s7 + $0x8] sm:$0xff]  }
 0x36d   :  { %v206_v45 = vmul.f32 %v1405_v9, %v196_v40  ;;  %v226_v8 = vmul.f32 %v1415_v18, %v196_v40  ;;  %v1062_v32 = vpack.c.bf16 %v1325_v43, %v1308_v39  ;;  %v1088_v39 = vld [vmem:[%s1631_s7] sm:$0xff]   ;;  %v1090_v43 = vld [vmem:[%s1631_s7 + $0x10] sm:$0xff]  }
 0x36e   :  { %209 = vrot.lane.b32.xlu1 %v205_v33, %s1162_s2 }
 0x36f   :  { %211 = vrot.lane.b32.xlu0 %v206_v45, %s1162_s2 }
 0x372   :  { %229 = vrot.lane.b32.xlu1 %v225_v58, %s1163_s4 }
 0x373   :  { %360 = vrot.lane.b32.xlu0 %v335_v28, %s1157_s13  ;;  %v1050_v28 = vpack.c.bf16 %v1298_v37, %v1286_v34 }
 0x375   :  { %1051 = vmatprep.subr.bf16.mxu0 %v1050_v28 }
 0x376   :  { %1053 = vmatpush3.bf16.msra.mxu0 %v1050_v28 }
 0x377   :  { %231 = vrot.lane.b32.xlu0 %v226_v8, %s1163_s4  ;;  %1055 = vmatprep.subr.bf16.mxu0 %v1054_v29 }
 0x37a   :  { %1057 = vmatpush3.bf16.msra.mxu0 %v1054_v29  ;;  %v1104_v29 = vld [vmem:[%s1635_s11] sm:$0xff]  }
 0x37b   :  { %1059 = vmatprep.subr.bf16.mxu0 %v1058_v30 }
 0x37e   :  { %1061 = vmatpush3.bf16.msra.mxu0 %v1058_v30  ;;  %v1107_v30 = vld [vmem:[%s1635_s11 + $0x18] sm:$0xff]  }
 0x37f   :  { %1063 = vmatprep.subr.bf16.mxu0 %v1062_v32 }
 0x382   :  { %1065 = vmatpush3.bf16.msra.mxu0 %v1062_v32  ;;  %v1108_v32 = vld [vmem:[%s1635_s11 + $0x20] sm:$0xff]  }
 0x383   :  { %1006 = vmatprep.subr.bf16.mxu0 %v1160_v31 }
 0x3d2   :  { %v355_v59 = vpop.permute.xlu1 %354 }
 0x3d3   :  { %v366_v60 = vsel %vm62_vm0, %v355_v59, 0 }
 0x3d4   :  { %976 = vmatpush3.bf16.xpose.msra.mxu1 %v366_v60 }
 0x3d5   :  { %977 = vmatprep.subr.bf16.mxu1 %v1160_v31 }
 0x3d6   :  { %v357_v9 = vpop.permute.xlu0 %356 }
 0x3d7   :  { %v369_v61 = vsel %vm62_vm0, %v357_v9, 0 }
 0x3da   :  { %v359_v62 = vpop.permute.xlu1 %358 }
 0x3db   :  { %v372_v3 = vsel %vm62_vm0, %v359_v62, 0 }
 0x3dc   :  { %978 = vmatpush3.bf16.xpose.msra.mxu1 %v369_v61 }
 0x3dd   :  { %979 = vmatprep.subr.bf16.mxu1 %v1160_v31 }
 0x3e0   :  { %v210_v17 = vpop.permute.xlu1 %209 }
 0x3e1   :  { %v212_v2 = vpop.permute.xlu0 %211  ;;  %v215_v10 = vadd.f32 %v210_v17, %v182_v4  ;;  %v1095_v4 = vld [vmem:[%s1634_s10 + $0x10] ss:$8 sps:$4 sm:$0xff]  }
 0x3e2   :  { %v216_v12 = vadd.f32 %v212_v2, %v183_v5  ;;  %v1100_v5 = vld [vmem:[%s1634_s10 + $0x24] ss:$8 sps:$4 sm:$0xff]  }
 0x3e4   :  { %980 = vmatpush3.bf16.xpose.msra.mxu1 %v372_v3  ;;  %v230_v6 = vpop.permute.xlu1 %229 }
 0x3e5   :  { %v361_v18 = vpop.permute.xlu0 %360  ;;  %981 = vmatprep.subr.bf16.mxu1 %v1160_v31  ;;  %v235_v14 = vadd.f32 %v230_v6, %v215_v10  ;;  %v1098_v6 = vld [vmem:[%s1634_s10 + $0x20] ss:$8 sps:$4 sm:$0xff]   ;;  %v1103_v10 = vld [vmem:[%s1634_s10 + $0x34] ss:$8 sps:$4 sm:$0xff]  }
 0x3e6   :  { %v375_v16 = vsel %vm62_vm0, %v361_v18, 0  ;;  %v1097_v18 = vld [vmem:[%s1634_s10 + $0x14] ss:$8 sps:$4 sm:$0xff]  }
 0x3e9   :  { %v232_v13 = vpop.permute.xlu0 %231 }
 0x3ea   :  { %v236_v15 = vadd.f32 %v232_v13, %v216_v12  ;;  %v1101_v12 = vld [vmem:[%s1634_s10 + $0x30] ss:$8 sps:$4 sm:$0xff]  }
 0x3ec   :  { %v237_v19 = vpack.c.bf16 %v236_v15, %v235_v14  ;;  %982 = vmatpush3.bf16.xpose.msra.mxu1 %v375_v16 }
 0x3ed   :  { %1018 = vmatprep.subr.bf16.mxu1 %v1160_v31 }
 0x3f3   :  { %984 = vmatmul.mubr.msk.bf16.vlgmr.msra.gmra.mrb[0].mxu1 %vm62_vm0, %v237_v19 }
 0x3f4   :  { %1026 = vmatprep.mubr.msk.bf16.mxu1 %vm1161_vm2, %v1160_v31  ;;  %1019 = vmatpush3.bf16.msra.mxu1 %v1088_v39 }
 0x3f5   :  { %1020 = vmatprep.subr.bf16.mxu1 %v1160_v31 }
 0x3f8   :  { %1021 = vmatpush3.bf16.msra.mxu1 %v1089_v42 }
 0x3f9   :  { %1022 = vmatprep.subr.bf16.mxu1 %v1160_v31 }
 0x3fc   :  { %1023 = vmatpush3.bf16.msra.mxu1 %v1090_v43 }
 0x3fd   :  { %1024 = vmatprep.subr.bf16.mxu1 %v1160_v31 }
 0x400   :  { %1025 = vmatpush3.bf16.msra.mxu1 %v1091_v53 }
 0x401   :  { %1030 = vmatprep.subr.bf16.mxu1 %v1160_v31 }
 0x4c6   :  { %v411_v44 = vpop.f32.mrb[0].mxu1 }
 0x4c7   :  { %v412_v7 = vadd.f32 %v411_v44, %v348_v36  ;;  %v985_v20 = vpop.f32.mrb[1].mxu1  ;;  %v639_v44 = vld [vmem:[%s1633_s9] sm:$0x1] }
 0x4c8   :  { %v414_v21 = vpop.f32.mrb[2].mxu1 }
 0x4c9   :  { %v415_v23 = vadd.f32 %v414_v21, %v349_v63  ;;  %v986_v24 = vpop.f32.mrb[3].mxu1  ;;  %v418_v26 = vsel %vm62_vm0, %v412_v7, -inf  ;;  %v656_v63 = vadd.f32 1.0, %v639_v44 }
 0x4ca   :  { %419 = vmax.xlane.f32.xlu1 %v418_v26 }
 0x4cb   :  { %v421_v27 = vsel %vm62_vm0, %v415_v23, -inf  ;;  %v661_v20 = vrot.slane %v656_v63, %v82_v25  ;;  %v1106_v25 = vld [vmem:[%s1635_s11 + $0x10] sm:$0xff]  }
 0x4cc   :  { %422 = vmax.xlane.f32.xlu0 %v421_v27 }
 0x557   :  { %v420_v34 = vpop.xlane.xlu1 %419 }
 0x558   :  { %v424_v37 = vsub.f32 %v412_v7, %v420_v34  ;;  %v1109_v34 = vld [vmem:[%s1635_s11 + $0x28] sm:$0xff]  }
 0x559   :  { %v423_v33 = vpop.xlane.xlu0 %422 }
 0x55a   :  { %v426_v40 = vmul.f32 1.442695, %v424_v37  ;;  %v425_v45 = vsub.f32 %v415_v23, %v423_v33  ;;  %v1110_v37 = vld [vmem:[%s1635_s11 + $0x30] sm:$0xff]   ;;  %v1111_v33 = vld [vmem:[%s1635_s11 + $0x38] sm:$0xff]   ;;  %s1164_s11 = smov [#allocation2]  }
 0x55b   :  { %s895_s25 = sshll.u32 %s1164_s11, 4  ;;  %s896_s25 = int_to_ptr.vmem [resolvable:$true] %s895_s25 }
 0x55c   :  { %1116 = vpow2.f32 %v426_v40  ;;  %v428_v35 = vmul.f32 1.442695, %v425_v45  ;;  %s1132_s26 = scalar_lea.vmem %s896_s25, 256  ;;  %p1137_p1 = scmp.lt.s32.totalorder %s896_s25, %s896_s25 }
 0x55d   :  { %p1133_p0 = scmp.ne.s32.totalorder %s896_s25, %s1132_s26  ;;  %p1138_p2 = scmp.lt.s32.totalorder %s1132_s26, %s1132_s26 }
 0x55e   :  { %1118 = vpow2.f32 %v428_v35 }
 0x55f   :  { %p1139_p3 = por %p1138_p2, %p1137_p1 }
 0x561   :  { %p1140_p4 = pnand %p1139_p3, %p1133_p0 }
 0x566   :  { %v1117_v41 = vpop.eup %1116 }
 0x567   :  { %1003 = vmatprep.mubr.msk.f32.mxu0 %vm62_vm0, %v1117_v41 }
 0x568   :  { %v1119_v38 = vpop.eup %1118 }
 0x569   :  { %1004 = vmatmul.mubr.msk.f32.vlgmr.msra.gmra.mrb[4].mxu0 %vm62_vm0, %v1119_v38 }
 0x56a   :  { %1007 = vmatpush3.bf16.msra.mxu0 %v344_v54  ;;  %1014 = vmatprep.mubr.msk.bf16.mxu0 %vm1161_vm2, %v1160_v31 }
 0x56b   :  { %1008 = vmatprep.subr.bf16.mxu0 %v1160_v31 }
 0x56e   :  { %1009 = vmatpush3.bf16.msra.mxu0 %v345_v55 }
 0x56f   :  { %1010 = vmatprep.subr.bf16.mxu0 %v1160_v31 }
 0x572   :  { %1011 = vmatpush3.bf16.msra.mxu0 %v346_v56 }
 0x573   :  { %1012 = vmatprep.subr.bf16.mxu0 %v1160_v31 }
 0x576   :  { %1013 = vmatpush3.bf16.msra.mxu0 %v347_v57 }
 0x63c   :  { %v1005_v46 = vpop.f32.mrb[4].mxu0 }
 0x63d   :  { %1120 = vrcp.f32 %v1005_v46  ;;  %v502_v47 = vpop.f32.mrb[5].mxu0 }
 0x63e   :  { %1122 = vrcp.f32 %v502_v47 }
 0x647   :  { %v1121_v48 = vpop.eup %1120 }
 0x648   :  { %v1123_v49 = vpop.eup %1122  ;;  %v514_v50 = vmul.f32 %v1121_v48, %v1119_v38 }
 0x649   :  { %v513_v51 = vmul.f32 %v1123_v49, %v1117_v41 }
 0x64b   :  { %v515_v52 = vpack.c.bf16 %v514_v50, %v513_v51 }
 0x64d   :  { %1015 = vmatmul.mubr.msk.bf16.vlgmr.msra.gmra.mrb[8].mxu0 %vm62_vm0, %v515_v52 }
 0x64e   :  { %749 = vmatprep.mubr.bf16.mxu0 %v1156_v11 }
 0x720   :  { %v553_v54 = vpop.f32.mrb[8].mxu0 }
 0x721   :  { %v1016_v55 = vpop.f32.mrb[9].mxu0 }
 0x722   :  { %v556_v56 = vpop.f32.mrb[10].mxu0 }
 0x723   :  { %v560_v57 = vpack.c.bf16 %v556_v56, %v553_v54  ;;  %v1017_v58 = vpop.f32.mrb[11].mxu0 }
 0x725   :  { %1027 = vmatmul.mubr.msk.bf16.vlgmr.msra.gmra.mrb[4].mxu1 %vm62_vm0, %v560_v57 }
 0x726   :  { %1046 = vmatprep.mubr.msk.bf16.mxu1 %vm1161_vm2, %v1160_v31  ;;  %1031 = vmatpush3.bf16.msra.mxu1 %v1104_v29 }
 0x727   :  { %1032 = vmatprep.subr.bf16.mxu1 %v1160_v31 }
 0x72a   :  { %1033 = vmatpush3.bf16.msra.mxu1 %v1105_v22 }
 0x72b   :  { %1034 = vmatprep.subr.bf16.mxu1 %v1160_v31 }
 0x72e   :  { %1035 = vmatpush3.bf16.msra.mxu1 %v1106_v25 }
 0x72f   :  { %1036 = vmatprep.subr.bf16.mxu1 %v1160_v31 }
 0x732   :  { %1037 = vmatpush3.bf16.msra.mxu1 %v1107_v30 }
 0x733   :  { %1038 = vmatprep.subr.bf16.mxu1 %v1160_v31 }
 0x736   :  { %1039 = vmatpush3.bf16.msra.mxu1 %v1108_v32 }
 0x737   :  { %1040 = vmatprep.subr.bf16.mxu1 %v1160_v31 }
 0x73a   :  { %1041 = vmatpush3.bf16.msra.mxu1 %v1109_v34 }
 0x73b   :  { %1042 = vmatprep.subr.bf16.mxu1 %v1160_v31 }
 0x73e   :  { %1043 = vmatpush3.bf16.msra.mxu1 %v1110_v37 }
 0x73f   :  { %1044 = vmatprep.subr.bf16.mxu1 %v1160_v31 }
 0x742   :  { %1045 = vmatpush3.bf16.msra.mxu1 %v1111_v33 }
 0x7f8   :  { %v630_v8 = vpop.f32.mrb[4].mxu1 }
 0x7f9   :  { %v1533_v11 = vadd.f32 %v630_v8, %v1234_v0  ;;  %v1028_v59 = vpop.f32.mrb[5].mxu1  ;;  %v1094_v0 = vld [vmem:[%s1634_s10 + $0x4] ss:$8 sps:$4 sm:$0xff]  }
 0x7fa   :  { %v633_v60 = vpop.f32.mrb[6].mxu1  ;;  %717 = vmatprep.subr.bf16.mxu0 %v1094_v0 }
 0x7fb   :  { %v1536_v9 = vadd.f32 %v633_v60, %v1239_v1  ;;  %v1029_v61 = vpop.f32.mrb[7].mxu1  ;;  %v640_v62 = vmul.f32 %v1533_v11, %v1533_v11  ;;  %v1092_v1 = vld [vmem:[%s1634_s10] ss:$8 sps:$4 sm:$0xff]  }
 0x7fc   :  { %718 = vmatpush1.bf16.msra.mxu0 %v1092_v1 }
 0x7fd   :  { %v642_v17 = vsel %vm62_vm0, %v640_v62, 0.0  ;;  %v641_v2 = vmul.f32 %v1536_v9, %v1536_v9  ;;  %719 = vmatprep.subr.bf16.mxu0 %v1097_v18 }
 0x7fe   :  { %643 = vadd.xlane.f32.xlu0 %v642_v17 }
 0x7ff   :  { %v645_v3 = vsel %vm62_vm0, %v641_v2, 0.0 }
 0x800   :  { %646 = vadd.xlane.f32.xlu1 %v645_v3  ;;  %720 = vmatpush1.bf16.msra.mxu0 %v1095_v4 }
 0x801   :  { %721 = vmatprep.subr.bf16.mxu0 %v1100_v5 }
 0x804   :  { %722 = vmatpush1.bf16.msra.mxu0 %v1098_v6 }
 0x805   :  { %723 = vmatprep.subr.bf16.mxu0 %v1103_v10 }
 0x808   :  { %724 = vmatpush1.bf16.msra.mxu0 %v1101_v12 }
 0x88b   :  { %v644_v13 = vpop.xlane.xlu0 %643 }
 0x88c   :  { %v648_v14 = vmul.f32 0.015625, %v644_v13 }
 0x88d   :  { %v647_v15 = vpop.xlane.xlu1 %646 }
 0x88e   :  { %v650_v16 = vadd.f32 1e-06, %v648_v14  ;;  %v649_v19 = vmul.f32 0.015625, %v647_v15 }
 0x890   :  { %1124 = vrsqrt.f32 %v650_v16  ;;  %v651_v36 = vadd.f32 1e-06, %v649_v19 }
 0x892   :  { %1126 = vrsqrt.f32 %v651_v36 }
 0x89a   :  { %v1125_v7 = vpop.eup %1124 }
 0x89b   :  { %v654_v21 = vmul.f32 %v1125_v7, %v1533_v11 }
 0x89c   :  { %v1127_v23 = vpop.eup %1126 }
 0x89d   :  { %v655_v24 = vmul.f32 %v1127_v23, %v1536_v9  ;;  %v663_v26 = vmul.f32 %v661_v20, %v654_v21 }
 0x89f   :  { %v664_v27 = vmul.f32 %v661_v20, %v655_v24 }
 0x8a1   :  { %v665_v28 = vpack.c.bf16 %v664_v27, %v663_v26 }
 0x8a3   :  { %932 = vmatmul.mubr.msk.bf16.vlgmr.msra.gmra.mrb[12].mxu0 %vm62_vm0, %v665_v28 }
 0x976   :  { %v751_v40 = vpop.f32.mrb[12].mxu0 }
 0x977   :  { %v762_v45 = vmul.f32 0.044715, %v751_v40  ;;  %v753_v35 = vpop.f32.mrb[13].mxu0  ;;  %v760_v52 = vmul.f32 0.5, %v751_v40 }
 0x978   :  { %v755_v41 = vpop.f32.mrb[14].mxu0 }
 0x979   :  { %v764_v38 = vmul.f32 %v762_v45, %v751_v40  ;;  %v763_v39 = vmul.f32 0.044715, %v755_v41  ;;  %v757_v42 = vpop.f32.mrb[15].mxu0  ;;  %v761_v56 = vmul.f32 0.5, %v755_v41 }
 0x97b   :  { %v766_v43 = vmul.f32 %v764_v38, %v751_v40  ;;  %v765_v46 = vmul.f32 %v763_v39, %v755_v41 }
 0x97d   :  { %v768_v47 = vadd.f32 %v766_v43, %v751_v40  ;;  %v767_v48 = vmul.f32 %v765_v46, %v755_v41 }
 0x97f   :  { %v770_v49 = vmul.f32 0.7978846, %v768_v47  ;;  %v769_v50 = vadd.f32 %v767_v48, %v755_v41 }
 0x981   :  { %1128 = vtanh.f32 %v770_v49  ;;  %v771_v31 = vmul.f32 0.7978846, %v769_v50 }
 0x983   :  { %1130 = vtanh.f32 %v771_v31 }
 0x98b   :  { %v1129_v51 = vpop.eup %1128 }
 0x98c   :  { %v774_v53 = vadd.f32 1.0, %v1129_v51 }
 0x98d   :  { %v1131_v54 = vpop.eup %1130 }
 0x98e   :  { %v776_v55 = vmul.f32 %v774_v53, %v760_v52  ;;  %v775_v57 = vadd.f32 1.0, %v1131_v54 }
 0x990   :  { %v778_v58 = vmul.f32 %v776_v55, %v753_v35  ;;  %v777_v8 = vmul.f32 %v775_v57, %v761_v56 }
 0x992   :  { %v779_v59 = vmul.f32 %v777_v8, %v757_v42 }
 0x994   :  { %v780_v60 = vpack.c.bf16 %v779_v59, %v778_v58 }
 0x996   :  { %1047 = vmatmul.mubr.bf16.vlgmr.msra.gmra.mrb[8].mxu1 %v780_v60 }
 0xa69   :  { %v879_v61 = vpop.f32.mrb[8].mxu1 }
 0xa6a   :  { %v886_v62 = vadd.f32 %v879_v61, %v1533_v11  ;;  %v1048_v17 = vpop.f32.mrb[9].mxu1 }
 0xa6b   :  { %v882_v2 = vpop.f32.mrb[10].mxu1 }
 0xa6c   :  { %888 = vst.msk [vmem:[#allocation2] sm:$0xff] %vm62_vm0, %v886_v62  ;;  %v887_v3 = vadd.f32 %v882_v2, %v1536_v9  ;;  %v1049_v0 = vpop.f32.mrb[11].mxu1 }
 0xa6e   :  { %889 = vst.msk [vmem:[#allocation2 + $0x8] sm:$0xff] %vm62_vm0, %v887_v3 }
 0xa6f   :  { %1143 = shalt.err (!%p1140_p4)
}
 0xa70   :  { %s1144_s0 = scalar_lea.hbm %s1636_s12, 256 }
 0xa71   :  { %p1145_p5 = scmp.ne.s32.totalorder %s1636_s12, %s1144_s0  ;;  %p1148_p6 = scmp.lt.u32.totalorder %s1144_s0, %s1636_s12 }
 0xa73   :  { %p1150_p7 = pnand %p1148_p6, %p1145_p5 }
 0xa75   :  { %1153 = shalt.err (!%p1150_p7)
}
 0xa76   :  { %s1165_s30 = smov 128  }
 0xa77   :  { %901 = dma.vmem_to_hbm [thread:$0]  %s896_s25, 256, %s1636_s12, [#allocation3], %s1165_s30, %s1165_s30, %s1159_s6  }
 0xa78   :  { %1154 = dma.done.wait [#allocation3], 256  }
 0xa79   :  { %1155 = vsyncadd [#allocation3], 4294967040 }
 0xa7a   :  { %905 = vsyncpa [#allocation3], 1 }

</bundles_post_ra>
